<compile_context>
chip_gen: v7x
topology: tpu7x:2x2x1
jax: 0.10.0
libtpu: 0.0.40
codegen_flags: <defaults>
</compile_context>

<pallas_src>
import functools

import jax
import jax.numpy as jnp
from jax.experimental import pallas as pl
from jax.experimental.pallas import tpu as pltpu


def _rmsnorm_kernel(x_ref, w_ref, o_ref, *, eps: float):
    # Square + reduce over lanes, rsqrt on the EUP, scale, round-trip through
    # x dtype (matches PyTorch `.type_as(x)`), apply weight in f32, store in
    # the requested output dtype.
    x = x_ref[...].astype(jnp.float32)
    inv_dim = 1.0 / x_ref.shape[-1]
    mean_sq = jnp.sum(x * x, axis=-1, keepdims=True) * inv_dim
    inv_rms = jax.lax.rsqrt(mean_sq + eps)
    normed = (x * inv_rms).astype(x_ref.dtype)                   # .type_as(x)
    y = normed.astype(jnp.float32) * w_ref[...].astype(jnp.float32)
    o_ref[...] = y.astype(o_ref.dtype)


def _round_down(v: int, m: int) -> int:
    return (v // m) * m


def _tpu_generation_info():
    """Return (physical_vmem_bytes, is_multi_tensorcore_part)."""
    try:
        info = pltpu.get_tpu_info()
        vmem_cap = int(info.vmem_capacity_bytes)
    except Exception:
        # Conservative fallback (v5e/v6e-like: 128 MiB VMEM, single TC).
        return 128 << 20, False
    # v7x-class parts expose <= 64 MiB VMEM per TensorCore and have 2 TCs per
    # chip; v5e/v6e expose 128 MiB and a single TC.
    multi_tc = vmem_cap <= (64 << 20)
    return vmem_cap, multi_tc


def _sublane_pack(x_bytes: int) -> int:
    # 8 rows per vreg sublane group for 4-byte dtypes, 16 for 2-byte, 32 for 1-byte.
    return 8 * max(1, 4 // max(1, x_bytes))


def _pick_tile_rows(rows: int, dim: int, x_bytes: int, o_bytes: int,
                    vmem_cap: int, multi_tc: bool) -> int:
    """Row-tile size for a memory-bound [rows, dim] elementwise+reduce op."""
    pack = _sublane_pack(x_bytes)

    # Per-generation target bytes of x per tile:
    #  * multi-TC / high-BW parts (v7x): ~6 MiB so the 0.35 us step overhead
    #    is <5-8% of a step at 3.2 TB/s.
    #  * single-TC parts (v5e/v6e): 2 MiB already sits at ~85%+ of roofline.
    target_bytes = (6 << 20) if multi_tc else (2 << 20)
    tm = max(pack, _round_down(target_bytes // max(1, dim * x_bytes), pack))

    # Clamp so double-buffered x+out tiles (plus slack) fit the VMEM budget.
    per_row_vmem = 2 * dim * (x_bytes + o_bytes)
    budget = max(1 << 20, int(0.75 * vmem_cap) - (4 << 20))
    tm_cap = max(pack, _round_down(budget // max(1, per_row_vmem), pack))
    tm = min(tm, tm_cap)

    if tm >= rows:
        # One block covering all rows (full-extent block is always legal).
        return rows

    if multi_tc:
        # v7x: the single "parallel" grid axis shards across 2 TensorCores.
        # Prefer an even number of steps >= 6 (>= 3 per core) so neither core
        # idles on a lone tail tile and DMA/compute/writeback overlap.
        steps = pl.cdiv(rows, tm)
        target_steps = None
        if steps < 6:
            target_steps = 6
        elif steps % 2 == 1:
            target_steps = steps + 1
        if target_steps is not None:
            cand = _round_down(pl.cdiv(rows, target_steps), pack)
            if cand >= pack:
                new_steps = pl.cdiv(rows, cand)
                if new_steps >= 6 and new_steps % 2 == 0:
                    tm = cand
    return tm


def rmsnorm(x: jax.Array, weight: jax.Array, eps: float = 1e-6,
            *, tile_rows: int | None = None, out_dtype=None) -> jax.Array:
    """RMSNorm over the last axis of x. weight has shape (dim,)."""
    orig_shape = x.shape
    dim = orig_shape[-1]
    rows = 1
    for s in orig_shape[:-1]:
        rows *= s

    x2d = x.reshape(rows, dim)
    w2d = weight.reshape(1, dim)

    # Default to x.dtype to keep HBM write traffic minimal.  The weight is
    # still applied in f32 inside the kernel; pass out_dtype=jnp.float32 for
    # exact torch promotion (bf16 x * f32 weight -> f32 out).
    if out_dtype is None:
        out_dtype = x.dtype
    out_dtype = jnp.dtype(out_dtype)

    x_bytes = jnp.dtype(x.dtype).itemsize
    o_bytes = out_dtype.itemsize
    w_bytes = jnp.dtype(weight.dtype).itemsize
    pack = _sublane_pack(x_bytes)

    vmem_cap, multi_tc = _tpu_generation_info()
    vmem_cap_budget = max(1 << 20, int(0.75 * vmem_cap) - (4 << 20))
    per_row_vmem = 2 * dim * (x_bytes + o_bytes)
    tm_vmem_cap = max(pack, _round_down(vmem_cap_budget // max(1, per_row_vmem), pack))

    if tile_rows is None:
        tm = _pick_tile_rows(rows, dim, x_bytes, o_bytes, vmem_cap, multi_tc)
    else:
        # Harden the override: round to the sublane pack factor and clamp to
        # the VMEM budget so it can neither violate the (8,128) block rule nor
        # fail compilation on VMEM.
        tm = min(int(tile_rows), rows)
        if tm < rows:
            tm = max(pack, _round_down(tm, pack))
        tm = min(tm, tm_vmem_cap)
        tm = min(tm, rows)
        if tm >= rows:
            tm = rows

    # Double-buffered x and out tiles + resident weight + slack, capped at 75%
    # of the physical VMEM reported for this generation.
    vmem_limit = 2 * tm * dim * (x_bytes + o_bytes) + 2 * dim * w_bytes + (2 << 20)
    vmem_limit = max(vmem_limit, 4 << 20)
    vmem_limit = min(vmem_limit, int(0.75 * vmem_cap))

    grid = (pl.cdiv(rows, tm),)

    out = pl.pallas_call(
        functools.partial(_rmsnorm_kernel, eps=eps),
        out_shape=jax.ShapeDtypeStruct((rows, dim), out_dtype),
        grid_spec=pltpu.PrefetchScalarGridSpec(
            num_scalar_prefetch=0,
            grid=grid,
            in_specs=[
                pl.BlockSpec((tm, dim), lambda i: (i, 0)),   # x row tile
                pl.BlockSpec((1, dim), lambda i: (0, 0)),    # weight (resident)
            ],
            out_specs=pl.BlockSpec((tm, dim), lambda i: (i, 0)),
        ),
        compiler_params=pltpu.CompilerParams(
            dimension_semantics=("parallel",),
            vmem_limit_bytes=int(vmem_limit),
        ),
    )(x2d, w2d)

    return out.reshape(orig_shape)


def rmsnorm_ref(x, weight, eps):
    # Exact PyTorch semantics: f32 accumulation, round-trip to x dtype, then
    # multiply by the (f32) weight with normal promotion.
    xf = x.astype(jnp.float32)
    inv = jax.lax.rsqrt(jnp.mean(xf * xf, axis=-1, keepdims=True) + eps)
    return (xf * inv).astype(x.dtype) * weight


if __name__ == "__main__":
    key = jax.random.PRNGKey(0)
    eps = 1e-5

    # --- Primary test: small shape consistent with the module (f32) ---
    batch, seq, dim = 2, 8, 128
    k0, k1, k2 = jax.random.split(key, 3)
    x = jax.random.normal(k0, (batch, seq, dim), dtype=jnp.float32)
    weight = jnp.ones((dim,), dtype=jnp.float32)   # nn.Parameter(torch.ones(dim))

    out = jax.block_until_ready(rmsnorm(x, weight, eps))
    ref = rmsnorm_ref(x, weight, eps)
    assert out.shape == x.shape and out.dtype == jnp.float32
    assert jnp.allclose(out, ref, atol=1e-5, rtol=1e-5), "f32 mismatch vs reference"

    # --- bf16 activations, f32 weight: default output stays bf16 (bandwidth) ---
    xb = jax.random.normal(k1, (batch, seq, dim), dtype=jnp.float32).astype(jnp.bfloat16)
    wb = (1.0 + 0.1 * jax.random.normal(k2, (dim,), dtype=jnp.float32))
    out_b = jax.block_until_ready(rmsnorm(xb, wb, eps))
    ref_b = rmsnorm_ref(xb, wb, eps)              # f32 (torch promotion)
    assert out_b.dtype == jnp.bfloat16
    assert jnp.allclose(out_b.astype(jnp.float32),
                        ref_b.astype(jnp.bfloat16).astype(jnp.float32),
                        atol=2e-2, rtol=2e-2), "bf16-out mismatch vs reference"

    # --- bf16 activations with explicit torch-style f32 promotion ---
    out_bp = jax.block_until_ready(rmsnorm(xb, wb, eps, out_dtype=jnp.float32))
    assert out_bp.dtype == jnp.float32
    assert jnp.allclose(out_bp, ref_b, atol=2e-2, rtol=2e-2), "promoted-out mismatch"

    # --- Multi-step grid (forced small tile) with a non-divisible tail block ---
    xr = jax.random.normal(k1, (3, 7, 256), dtype=jnp.float32)
    wr = jnp.ones((256,), dtype=jnp.float32)
    out_r = jax.block_until_ready(rmsnorm(xr, wr, eps, tile_rows=8))
    ref_r = rmsnorm_ref(xr, wr, eps)
    assert jnp.allclose(out_r, ref_r, atol=1e-5, rtol=1e-5), "ragged-grid mismatch"

    # --- User tile_rows not a multiple of the pack factor (hardened override) ---
    out_u = jax.block_until_ready(rmsnorm(xr, wr, eps, tile_rows=10))
    assert jnp.allclose(out_u, ref_r, atol=1e-5, rtol=1e-5), "unaligned tile override mismatch"

    # --- Multi-step divisible grid (exercises the pipelined path) ---
    xm = jax.random.normal(k2, (4, 16, 128), dtype=jnp.float32)
    out_m = jax.block_until_ready(rmsnorm(xm, weight, eps, tile_rows=16))
    ref_m = rmsnorm_ref(xm, weight, eps)
    assert jnp.allclose(out_m, ref_m, atol=1e-5, rtol=1e-5), "multi-step mismatch"

    print("KERNEL_OK")
</pallas_src>

<mosaic_0001>
module attributes {stable_mosaic.version = 11 : i64} {
  func.func @_rmsnorm_kernel(%arg0: i32, %arg1: memref<16x128xf32, #tpu.memory_space<vmem>>, %arg2: memref<1x128xf32, #tpu.memory_space<vmem>>, %arg3: memref<16x128xf32, #tpu.memory_space<vmem>>) attributes {dimension_semantics = [#tpu.dimension_semantics<parallel>], iteration_bounds = array<i64: 1>, scalar_prefetch = 0 : i64, scratch_operands = 0 : i64, tpu.core_type = #tpu.core_type<tc>, window_params = [{transform_indices = @transform_0, window_bounds = array<i64: 16, 128>}, {pipeline_mode = #tpu.pipeline_mode<synchronous>, transform_indices = @transform_1, window_bounds = array<i64: 1, 128>}, {transform_indices = @transform_2, window_bounds = array<i64: 16, 128>}]} {
    %c0 = arith.constant 0 : index
    %c0_0 = arith.constant 0 : index
    %0 = vector.load %arg1[%c0, %c0_0] : memref<16x128xf32, #tpu.memory_space<vmem>>, vector<16x128xf32>
    %1 = arith.mulf %0, %0 : vector<16x128xf32>
    %cst = arith.constant dense<0.000000e+00> : vector<16xf32>
    %2 = vector.multi_reduction <add>, %1, %cst [1] : vector<16x128xf32> to vector<16xf32>
    %3 = vector.shape_cast %2 : vector<16xf32> to vector<16x1xf32>
    %cst_1 = arith.constant 7.812500e-03 : f32
    %4 = vector.broadcast %cst_1 : f32 to vector<16x1xf32>
    %5 = arith.mulf %3, %4 : vector<16x1xf32>
    %cst_2 = arith.constant 9.99999974E-6 : f32
    %6 = vector.broadcast %cst_2 : f32 to vector<16x1xf32>
    %7 = arith.addf %5, %6 : vector<16x1xf32>
    %8 = math.rsqrt %7 : vector<16x1xf32>
    %9 = vector.broadcast %8 : vector<16x1xf32> to vector<16x128xf32>
    %10 = arith.mulf %0, %9 : vector<16x128xf32>
    %c0_3 = arith.constant 0 : index
    %c0_4 = arith.constant 0 : index
    %11 = vector.load %arg2[%c0_3, %c0_4] : memref<1x128xf32, #tpu.memory_space<vmem>>, vector<1x128xf32>
    %12 = vector.broadcast %11 : vector<1x128xf32> to vector<16x128xf32>
    %13 = arith.mulf %10, %12 : vector<16x128xf32>
    %c0_5 = arith.constant 0 : index
    %c0_6 = arith.constant 0 : index
    %14 = vector.load %arg3[%c0_5, %c0_6] : memref<16x128xf32, #tpu.memory_space<vmem>>, vector<16x128xf32>
    tpu.vector_store %arg3[%c0_5, %c0_6], %13 {strides = array<i32>} : memref<16x128xf32, #tpu.memory_space<vmem>>, vector<16x128xf32>,
    return
  }
  func.func @transform_0(%arg0: i32) -> (i32, i32) {
    %c0_i32 = arith.constant 0 : i32
    %c0_i32_0 = arith.constant 0 : i32
    return %arg0, %c0_i32 : i32, i32
  }
  func.func @transform_1(%arg0: i32) -> (i32, i32) {
    %c0_i32 = arith.constant 0 : i32
    %c0_i32_0 = arith.constant 0 : i32
    %c0_i32_1 = arith.constant 0 : i32
    return %c0_i32, %c0_i32_0 : i32, i32
  }
  func.func @transform_2(%arg0: i32) -> (i32, i32) {
    %c0_i32 = arith.constant 0 : i32
    %c0_i32_0 = arith.constant 0 : i32
    return %arg0, %c0_i32 : i32, i32
  }
}

</mosaic_0001>

<bundles_post_ra>
// kernel: tpu_custom_call.1
= control target key start
LH: loop header
LB: loop body
LE: loop exit
PB: predicated region body
PF: predicated region fallthrough
CT: control target
= control target key end

     0   :  { %7 = vsyncpa [#allocation3], 0  ;;  %s179_s0 = inlined_call_operand.hbm [shape: f32[16,128], index: 0, kind: input, shape index: {}]   ;;  %s180_s1 = inlined_call_operand.vmem [shape: f32[1,128], index: 1, kind: input, shape index: {}]   ;;  %s181_s2 = inlined_call_operand.hbm [shape: f32[16,128], index: 2, kind: output, shape index: {}]  }
   0x1   :  { %8 = vsyncpa [#allocation4], 0  ;;  %s127_s9 = smov [#allocation2]   ;;  %s79_s13 = scalar_lea.hbm %s179_s0, 256 }
   0x2   :  { %s14_s10 = sshll.u32 %s127_s9, 4  ;;  %p80_p0 = scmp.ne.s32.totalorder %s179_s0, %s79_s13  ;;  %s15_s10 = int_to_ptr.vmem [resolvable:$true] %s14_s10 }
   0x3   :  { %p83_p1 = scmp.lt.u32.totalorder %s79_s13, %s179_s0 }
   0x5   :  { %p85_p2 = pnand %p83_p1, %p80_p0 }
   0x7   :  { %88 = shalt.err (!%p85_p2)
}
   0x8   :  { %s89_s18 = scalar_lea.vmem %s15_s10, 256  ;;  %p94_p4 = scmp.lt.s32.totalorder %s15_s10, %s15_s10 }
   0x9   :  { %p90_p3 = scmp.ne.s32.totalorder %s15_s10, %s89_s18  ;;  %p95_p5 = scmp.lt.s32.totalorder %s89_s18, %s89_s18 }
   0xb   :  { %p96_p6 = por %p95_p5, %p94_p4 }
   0xd   :  { %p97_p7 = pnand %p96_p6, %p90_p3 }
   0xf   :  { %100 = shalt.err (!%p97_p7)
}
  0x10   :  { %s128_s19 = smov 128   ;;  %s129_s20 = smov 8  }
  0x11   :  { %20 = dma.hbm_to_vmem [thread:$0]  %s179_s0, 256, %s15_s10, [#allocation3], %s128_s19, %s128_s19, %s129_s20  }
  0x12   :  { %123 = dma.done.wait [#allocation3], 256  }
  0x13   :  { %124 = vsyncadd [#allocation3], 4294967040  ;;  %v26_v0 = vld [vmem:[#allocation2] sm:$0xff]  ;;  %v27_v1 = vld [vmem:[#allocation2 + $0x8] sm:$0xff]  ;;  %s130_s0 = smov [#allocation5]  }
  0x14   :  { %v28_v2 = vmul.f32 %v26_v0, %v26_v0  ;;  %v29_v3 = vmul.f32 %v27_v1, %v27_v1  ;;  %v70_v11 = vld [vmem:[%s180_s1] ss:$0 sm:$0xff]  ;;  %s58_s25 = sshll.u32 %s130_s0, 4  ;;  %s59_s25 = int_to_ptr.vmem [resolvable:$true] %s58_s25 }
  0x15   :  { %s101_s26 = scalar_lea.vmem %s59_s25, 256  ;;  %p106_p9 = scmp.lt.s32.totalorder %s59_s25, %s59_s25 }
  0x16   :  { %30 = vadd.xlane.f32.xlu0 %v28_v2  ;;  %p102_p8 = scmp.ne.s32.totalorder %s59_s25, %s101_s26  ;;  %p107_p10 = scmp.lt.s32.totalorder %s101_s26, %s101_s26 }
  0x18   :  { %p108_p11 = por %p107_p10, %p106_p9 }
  0x1a   :  { %32 = vadd.xlane.f32.xlu0 %v29_v3  ;;  %p109_p12 = pnand %p108_p11, %p102_p8 }
  0xa3   :  { %v31_v4 = vpop.xlane.xlu0 %30 }
  0xa4   :  { %v34_v5 = vmul.f32 0.0078125, %v31_v4 }
  0xa6   :  { %v36_v6 = vadd.f32 1e-05, %v34_v5 }
  0xa7   :  { %v33_v7 = vpop.xlane.xlu0 %32 }
  0xa8   :  { %75 = vrsqrt.f32 %v36_v6  ;;  %v35_v8 = vmul.f32 0.0078125, %v33_v7 }
  0xaa   :  { %v37_v9 = vadd.f32 1e-05, %v35_v8 }
  0xac   :  { %77 = vrsqrt.f32 %v37_v9 }
  0xb2   :  { %v76_v10 = vpop.eup %75 }
  0xb3   :  { %v40_v12 = vmul.f32 %v76_v10, %v26_v0 }
  0xb5   :  { %v49_v13 = vmul.f32 %v70_v11, %v40_v12 }
  0xb6   :  { %v78_v14 = vpop.eup %77 }
  0xb7   :  { %v41_v15 = vmul.f32 %v78_v14, %v27_v1  ;;  %51 = vst [vmem:[#allocation5] sm:$0xff] %v49_v13 }
  0xb9   :  { %v50_v16 = vmul.f32 %v70_v11, %v41_v15 }
  0xbb   :  { %52 = vst [vmem:[#allocation5 + $0x8] sm:$0xff] %v50_v16 }
  0xbc   :  { %112 = shalt.err (!%p109_p12)
}
  0xbd   :  { %s113_s1 = scalar_lea.hbm %s181_s2, 256 }
  0xbe   :  { %p114_p13 = scmp.ne.s32.totalorder %s181_s2, %s113_s1  ;;  %p117_p0 = scmp.lt.u32.totalorder %s113_s1, %s181_s2 }
  0xc0   :  { %p119_p1 = pnand %p117_p0, %p114_p13 }
  0xc2   :  { %122 = shalt.err (!%p119_p1)
}
  0xc3   :  { %64 = dma.vmem_to_hbm [thread:$0]  %s59_s25, 256, %s181_s2, [#allocation4], %s128_s19, %s128_s19, %s129_s20  }
  0xc4   :  { %125 = dma.done.wait [#allocation4], 256  }
  0xc5   :  { %126 = vsyncadd [#allocation4], 4294967040 }
  0xc6   :  { %68 = vsyncpa [#allocation3], 1 }
  0xc7   :  { %69 = vsyncpa [#allocation4], 1 }

</bundles_post_ra>
